<compile_context>
chip_gen: v5e
topology: v5e:2x2
jax: 0.10.0
libtpu: 0.0.40
codegen_flags: <defaults>
</compile_context>

<pallas_src>
import functools

import jax
import jax.numpy as jnp
from jax import lax
from jax.experimental import pallas as pl
from jax.experimental.pallas import tpu as pltpu


def _ensemble_kernel(x_ref, w_ref, b_ref, o_ref, *, inv_k):
    d = pl.program_id(0)

    @pl.when(d == 0)
    def _init():
        # Fold the summed bias in at init; final scale by 1/K covers it.
        o_ref[...] = jnp.sum(b_ref[...], axis=0, keepdims=True) * jnp.ones(
            (o_ref.shape[0], 1), dtype=o_ref.dtype
        )

    # Fused ensemble reduce over K: sum the K weight slabs (VPU, K-1 adds),
    # then one lane-dense MXU contraction over the D tile.
    w_sum = jnp.sum(w_ref[...], axis=0)  # (O, tile_d)
    o_ref[...] += lax.dot_general(
        x_ref[...],                       # (B, tile_d)
        w_sum,                            # (O, tile_d)
        dimension_numbers=(((1,), (1,)), ((), ())),  # contract over D (lanes)
        preferred_element_type=jnp.float32,
    )

    @pl.when(d == pl.num_programs(0) - 1)
    def _finalize():
        # compile-time constant 1/K (fmul), not a runtime divide
        o_ref[...] *= inv_k


def average_ensemble(x, weights, biases, *, tile_d=2048):
    """Average-ensemble of K linear heads.

    x:       (B, C, H, W) float32
    weights: (K, O, D) float32  -- D on the last (lane) axis, D = C*H*W
    biases:  (K, O)   float32
    returns: (B, O)   float32
    """
    B = x.shape[0]
    K, O, D = weights.shape
    x_flat = x.reshape(B, D)  # plain-JAX flatten (NCHW order)

    tile_d = min(tile_d, D)
    assert tile_d % 128 == 0 and D % tile_d == 0, (
        "D must be a multiple of 128 and divisible by tile_d"
    )
    n_d = D // tile_d  # == 1 at the demo shape -> single grid step

    grid_spec = pltpu.PrefetchScalarGridSpec(
        num_scalar_prefetch=0,
        grid=(n_d,),
        in_specs=[
            # x: one (B, tile_d) slice of the contraction axis per step
            pl.BlockSpec((B, tile_d), lambda d: (0, d)),
            # weights: all K heads for this D tile, D on the lane axis
            pl.BlockSpec((K, O, tile_d), lambda d: (0, 0, d)),
            # biases: tiny, full block every step
            pl.BlockSpec((K, O), lambda d: (0, 0)),
        ],
        # output block index constant over d -> resident accumulator output
        out_specs=pl.BlockSpec((B, O), lambda d: (0, 0)),
    )

    return pl.pallas_call(
        functools.partial(_ensemble_kernel, inv_k=1.0 / K),
        out_shape=jax.ShapeDtypeStruct((B, O), jnp.float32),
        grid_spec=grid_spec,
        compiler_params=pltpu.CompilerParams(
            dimension_semantics=("arbitrary",),  # D is a reduction axis
        ),
    )(x_flat, weights, biases)


if __name__ == "__main__":
    # Small shapes consistent with the module's forward.
    B, C, H, W = 2, 4, 16, 16
    K = 3            # number of member models in the ensemble
    OUT = 3          # outshape=3
    D = C * H * W    # 1024

    key = jax.random.PRNGKey(0)
    kx, kw, kb = jax.random.split(key, 3)

    x = jax.random.normal(kx, (B, C, H, W), dtype=jnp.float32)
    # Generated directly in (K, O, D) layout so D sits on the lane axis
    # (no wrapper-side transpose needed).
    weights = 0.02 * jax.random.normal(kw, (K, OUT, D), dtype=jnp.float32)
    biases = 0.1 * jax.random.normal(kb, (K, OUT), dtype=jnp.float32)

    out = jax.block_until_ready(average_ensemble(x, weights, biases))

    # Pure-JAX reference of the averaging semantics.
    x_flat = x.reshape(B, D)
    ref = jnp.mean(
        jnp.einsum("bd,kod->kbo", x_flat, weights) + biases[:, None, :], axis=0
    )
    assert out.shape == (B, OUT)
    assert jnp.allclose(out, ref, atol=1e-4, rtol=1e-4)

    print("KERNEL_OK")
</pallas_src>

<mosaic_0001>
module attributes {stable_mosaic.version = 11 : i64} {
  func.func @_ensemble_kernel(%arg0: i32, %arg1: memref<2x1024xf32, #tpu.memory_space<vmem>>, %arg2: memref<3x3x1024xf32, #tpu.memory_space<vmem>>, %arg3: memref<3x3xf32, #tpu.memory_space<vmem>>, %arg4: memref<2x3xf32, #tpu.memory_space<vmem>>) attributes {dimension_semantics = [#tpu.dimension_semantics<arbitrary>], iteration_bounds = array<i64: 1>, scalar_prefetch = 0 : i64, scratch_operands = 0 : i64, tpu.core_type = #tpu.core_type<tc>, window_params = [{transform_indices = @transform_0, window_bounds = array<i64: 2, 1024>}, {transform_indices = @transform_1, window_bounds = array<i64: 3, 3, 1024>}, {pipeline_mode = #tpu.pipeline_mode<synchronous>, transform_indices = @transform_2, window_bounds = array<i64: 3, 3>}, {pipeline_mode = #tpu.pipeline_mode<synchronous>, transform_indices = @transform_3, window_bounds = array<i64: 2, 3>}]} {
    %c0_i32 = arith.constant 0 : i32
    %0 = arith.cmpi eq, %arg0, %c0_i32 : i32
    %1 = arith.extui %0 : i1 to i32
    %c0_i32_0 = arith.constant 0 : i32
    %2 = arith.cmpi ne, %1, %c0_i32_0 : i32
    scf.if %2 {
      %c0_12 = arith.constant 0 : index
      %c0_13 = arith.constant 0 : index
      %13 = vector.load %arg3[%c0_12, %c0_13] : memref<3x3xf32, #tpu.memory_space<vmem>>, vector<3x3xf32>
      %cst_14 = arith.constant dense<0.000000e+00> : vector<3xf32>
      %14 = vector.multi_reduction <add>, %13, %cst_14 [0] : vector<3x3xf32> to vector<3xf32>
      %15 = vector.shape_cast %14 : vector<3xf32> to vector<1x3xf32>
      %cst_15 = arith.constant 1.000000e+00 : f32
      %16 = vector.broadcast %cst_15 : f32 to vector<2x1xf32>
      %17 = vector.broadcast %15 : vector<1x3xf32> to vector<2x3xf32>
      %18 = vector.broadcast %16 : vector<2x1xf32> to vector<2x3xf32>
      %19 = arith.mulf %17, %18 : vector<2x3xf32>
      %c0_16 = arith.constant 0 : index
      %c0_17 = arith.constant 0 : index
      %20 = vector.load %arg4[%c0_16, %c0_17] : memref<2x3xf32, #tpu.memory_space<vmem>>, vector<2x3xf32>
      tpu.vector_store %arg4[%c0_16, %c0_17], %19 {strides = array<i32>} : memref<2x3xf32, #tpu.memory_space<vmem>>, vector<2x3xf32>,
    } else {
    }
    %c0 = arith.constant 0 : index
    %c0_1 = arith.constant 0 : index
    %c0_2 = arith.constant 0 : index
    %3 = vector.load %arg2[%c0, %c0_1, %c0_2] : memref<3x3x1024xf32, #tpu.memory_space<vmem>>, vector<3x3x1024xf32>
    %cst = arith.constant dense<0.000000e+00> : vector<3x1024xf32>
    %4 = vector.multi_reduction <add>, %3, %cst [0] : vector<3x3x1024xf32> to vector<3x1024xf32>
    %c0_3 = arith.constant 0 : index
    %c0_4 = arith.constant 0 : index
    %5 = vector.load %arg4[%c0_3, %c0_4] : memref<2x3xf32, #tpu.memory_space<vmem>>, vector<2x3xf32>
    %c0_5 = arith.constant 0 : index
    %c0_6 = arith.constant 0 : index
    %6 = vector.load %arg1[%c0_5, %c0_6] : memref<2x1024xf32, #tpu.memory_space<vmem>>, vector<2x1024xf32>
    %cst_7 = arith.constant dense<0.000000e+00> : vector<2x3xf32>
    %7 = tpu.matmul %6, %4, %cst_7 {dimension_numbers = #tpu.dot_dimension_numbers<[1], [1], [0], [0], [0, 0, 1, 0], [], []>} : vector<2x1024xf32>, vector<3x1024xf32>, vector<2x3xf32> -> vector<2x3xf32>
    %8 = arith.addf %5, %7 : vector<2x3xf32>
    %c0_8 = arith.constant 0 : index
    %c0_9 = arith.constant 0 : index
    %9 = vector.load %arg4[%c0_8, %c0_9] : memref<2x3xf32, #tpu.memory_space<vmem>>, vector<2x3xf32>
    tpu.vector_store %arg4[%c0_8, %c0_9], %8 {strides = array<i32>} : memref<2x3xf32, #tpu.memory_space<vmem>>, vector<2x3xf32>,
    %c0_i32_10 = arith.constant 0 : i32
    %10 = arith.cmpi eq, %arg0, %c0_i32_10 : i32
    %11 = arith.extui %10 : i1 to i32
    %c0_i32_11 = arith.constant 0 : i32
    %12 = arith.cmpi ne, %11, %c0_i32_11 : i32
    scf.if %12 {
      %c0_12 = arith.constant 0 : index
      %c0_13 = arith.constant 0 : index
      %13 = vector.load %arg4[%c0_12, %c0_13] : memref<2x3xf32, #tpu.memory_space<vmem>>, vector<2x3xf32>
      %cst_14 = arith.constant 0.333333343 : f32
      %14 = vector.broadcast %cst_14 : f32 to vector<2x3xf32>
      %15 = arith.mulf %13, %14 : vector<2x3xf32>
      %c0_15 = arith.constant 0 : index
      %c0_16 = arith.constant 0 : index
      %16 = vector.load %arg4[%c0_15, %c0_16] : memref<2x3xf32, #tpu.memory_space<vmem>>, vector<2x3xf32>
      tpu.vector_store %arg4[%c0_15, %c0_16], %15 {strides = array<i32>} : memref<2x3xf32, #tpu.memory_space<vmem>>, vector<2x3xf32>,
    } else {
    }
    return
  }
  func.func @transform_0(%arg0: i32) -> (i32, i32) {
    %c0_i32 = arith.constant 0 : i32
    %c0_i32_0 = arith.constant 0 : i32
    return %c0_i32, %arg0 : i32, i32
  }
  func.func @transform_1(%arg0: i32) -> (i32, i32, i32) {
    %c0_i32 = arith.constant 0 : i32
    %c0_i32_0 = arith.constant 0 : i32
    %c0_i32_1 = arith.constant 0 : i32
    return %c0_i32, %c0_i32_0, %arg0 : i32, i32, i32
  }
  func.func @transform_2(%arg0: i32) -> (i32, i32) {
    %c0_i32 = arith.constant 0 : i32
    %c0_i32_0 = arith.constant 0 : i32
    %c0_i32_1 = arith.constant 0 : i32
    return %c0_i32, %c0_i32_0 : i32, i32
  }
  func.func @transform_3(%arg0: i32) -> (i32, i32) {
    %c0_i32 = arith.constant 0 : i32
    %c0_i32_0 = arith.constant 0 : i32
    %c0_i32_1 = arith.constant 0 : i32
    return %c0_i32, %c0_i32_0 : i32, i32
  }
}

</mosaic_0001>

<bundles_post_ra>
// kernel: tpu_custom_call.1
= control target key start
LH: loop header
LB: loop body
LE: loop exit
PB: predicated region body
PF: predicated region fallthrough
CT: control target
= control target key end

     0   :  { %8 = vsyncpa [#allocation3], 0  ;;  %s585_s0 = inlined_call_operand.hbm [shape: f32[2,1024], index: 0, kind: input, shape index: {}]   ;;  %s586_s1 = inlined_call_operand.hbm [shape: f32[3,3,1024], index: 1, kind: input, shape index: {}]   ;;  %s587_s2 = inlined_call_operand.hbm [shape: f32[3,3], index: 2, kind: input, shape index: {}]   ;;  %s588_s3 = inlined_call_operand.hbm [shape: f32[2,3], index: 3, kind: output, shape index: {}]  }
   0x1   :  { %9 = vsyncpa [#allocation6], 0  ;;  %s26_s14 = sshll.u32 %s586_s1, 4  ;;  %s27_s14 = int_to_ptr.hbm [resolvable:$true] %s26_s14 }
   0x2   :  { %10 = vsyncpa [#allocation4], 0  ;;  %s520_s15 = smov [#allocation5]   ;;  %s16_s19 = sshll.u32 %s585_s0, 4  ;;  %s17_s19 = int_to_ptr.hbm [resolvable:$true] %s16_s19 }
   0x3   :  { %s28_s16 = sshll.u32 %s520_s15, 4  ;;  %s521_s20 = smov 512   ;;  %s29_s16 = int_to_ptr.vmem [resolvable:$true] %s28_s16 }
   0x4   :  { %s522_s21 = smov 32   ;;  %s523_s22 = smov [#allocation2]  }
   0x5   :  { %34 = dma.hbm_to_vmem [thread:$0]  %s27_s14, 1536, %s29_s16, [#allocation6], %s521_s20, %s521_s20, %s522_s21  }
   0x6   :  { %s18_s23 = sshll.u32 %s523_s22, 4  ;;  %s40_s26 = sshll.u32 %s587_s2, 4  ;;  %s19_s23 = int_to_ptr.vmem [resolvable:$true] %s18_s23  ;;  %s41_s26 = int_to_ptr.hbm [resolvable:$true] %s40_s26 }
   0x7   :  { %21 = dma.hbm_to_vmem [thread:$0]  %s17_s19, 256, %s19_s23, [#allocation3]  }
   0x8   :  { %s524_s1 = smov [#allocation7]  }
   0x9   :  { %s42_s27 = sshll.u32 %s524_s1, 4  ;;  %s43_s27 = int_to_ptr.vmem [resolvable:$true] %s42_s27 }
   0xa   :  { %45 = dma.hbm_to_vmem [thread:$0]  %s41_s26, 64, %s43_s27, [#allocation6]  }
   0xb   :  { %514 = dma.done.wait [#allocation3], 256  }
   0xc   :  { %515 = vsyncadd [#allocation3], 4294967040 }
   0xd   :  { %516 = dma.done.wait [#allocation6], 1600  }
   0xe   :  { %517 = vsyncadd [#allocation6], 4294965696  ;;  %v74_v0 = vld [vmem:[#allocation5 + $0x8] sm:$0x77]  ;;  %v73_v1 = vld [vmem:[#allocation5] sm:$0x77] }
   0xf   :  { %99 = vst [vmem:[#allocation1 + $0x10] ss:$2 sm:$0xff] %v74_v0  ;;  %v76_v2 = vld [vmem:[#allocation5 + $0x18] sm:$0x77]  ;;  %v75_v3 = vld [vmem:[#allocation5 + $0x10] sm:$0x77] }
  0x10   :  { %97 = vst [vmem:[#allocation1] ss:$2 sm:$0xff] %v73_v1  ;;  %v78_v4 = vld [vmem:[#allocation5 + $0x28] sm:$0x77]  ;;  %v77_v5 = vld [vmem:[#allocation5 + $0x20] sm:$0x77] }
  0x11   :  { %103 = vst [vmem:[#allocation1 + $0x30] ss:$2 sm:$0xff] %v76_v2  ;;  %v80_v10 = vld [vmem:[#allocation5 + $0x38] sm:$0x77]  ;;  %v79_v13 = vld [vmem:[#allocation5 + $0x30] sm:$0x77] }
  0x12   :  { %101 = vst [vmem:[#allocation1 + $0x20] ss:$2 sm:$0xff] %v75_v3  ;;  %v82_v15 = vld [vmem:[#allocation5 + $0x48] sm:$0x77]  ;;  %vm160_vm0 = vcmask 1042432   ;;  %v202_v38 = vld [vmem:[#allocation2] sm:$0xff] }
  0x13   :  { %v81_v17 = vld [vmem:[#allocation5 + $0x40] sm:$0x77]  ;;  %v84_v22 = vld [vmem:[#allocation5 + $0x58] sm:$0x77]  ;;  %v83_v25 = vld [vmem:[#allocation5 + $0x50] sm:$0x77] }
  0x14   :  { %v203_v62 = vld [vmem:[#allocation2 + $0x8] sm:$0xff]  ;;  %vm63_vm1 = vcmask 18432   ;;  %vm71_vm2 = vcmask 17408   ;;  %s525_s0 = smov [#allocation8]   ;;  %s401_s30 = sshll.u32 %s588_s3, 4  ;;  %s402_s30 = int_to_ptr.hbm [resolvable:$true] %s401_s30 }
  0x15   :  { %s399_s2 = sshll.u32 %s525_s0, 4  ;;  %s400_s2 = int_to_ptr.vmem [resolvable:$true] %s399_s2 }
  0x16   :  { %v106_v6 = vld.sshfl [vmem:[#allocation1 + $0x10] sm:$0xff pattern:$0x75316420]  ;;  %v107_v7 = vld.sshfl [vmem:[#allocation1 + $0x18] sm:$0xff pattern:$0x75316420] }
  0x17   :  { %113 = vst [vmem:[#allocation1 + $0x10] ss:$2 sm:$0xff] %v78_v4  ;;  %v104_v8 = vld.sshfl [vmem:[#allocation1] sm:$0xff pattern:$0x75316420]  ;;  %v171_v20 = vsel %vm160_vm0, %v106_v6, 0.0 }
  0x18   :  { %v105_v9 = vld.sshfl [vmem:[#allocation1 + $0x8] sm:$0xff pattern:$0x75316420]  ;;  %v110_v11 = vld.sshfl [vmem:[#allocation1 + $0x30] sm:$0xff pattern:$0x75316420] }
  0x19   :  { %112 = vst [vmem:[#allocation1] ss:$2 sm:$0xff] %v77_v5  ;;  %v111_v12 = vld.sshfl [vmem:[#allocation1 + $0x38] sm:$0xff pattern:$0x75316420]  ;;  %v161_v21 = vsel %vm160_vm0, %v104_v8, 0.0 }
  0x1a   :  { %115 = vst [vmem:[#allocation1 + $0x30] ss:$2 sm:$0xff] %v80_v10  ;;  %v108_v14 = vld.sshfl [vmem:[#allocation1 + $0x20] sm:$0xff pattern:$0x75316420]  ;;  %v166_v27 = vsel %vm160_vm0, %v105_v9, 0.0 }
  0x1b   :  { %v109_v16 = vld.sshfl [vmem:[#allocation1 + $0x28] sm:$0xff pattern:$0x75316420]  ;;  %v176_v28 = vsel %vm160_vm0, %v107_v7, 0.0  ;;  %v191_v34 = vsel %vm160_vm0, %v110_v11, 0.0  ;;  %v196_v35 = vsel %vm160_vm0, %v111_v12, 0.0 }
  0x1c   :  { %114 = vst [vmem:[#allocation1 + $0x20] ss:$2 sm:$0xff] %v79_v13  ;;  %v181_v42 = vsel %vm160_vm0, %v108_v14, 0.0  ;;  %v186_v51 = vsel %vm160_vm0, %v109_v16, 0.0 }
  0x1e   :  { %v118_v18 = vld.sshfl [vmem:[#allocation1 + $0x10] sm:$0xff pattern:$0x75316420]  ;;  %v119_v19 = vld.sshfl [vmem:[#allocation1 + $0x18] sm:$0xff pattern:$0x75316420] }
  0x1f   :  { %125 = vst [vmem:[#allocation1 + $0x10] ss:$2 sm:$0xff] %v82_v15  ;;  %v172_v26 = vsel %vm160_vm0, %v118_v18, 0.0  ;;  %v177_v29 = vsel %vm160_vm0, %v119_v19, 0.0 }
  0x20   :  { %v116_v23 = vld.sshfl [vmem:[#allocation1] sm:$0xff pattern:$0x75316420]  ;;  %v117_v24 = vld.sshfl [vmem:[#allocation1 + $0x8] sm:$0xff pattern:$0x75316420]  ;;  %v173_v36 = vadd.f32 %v172_v26, %v171_v20  ;;  %v178_v37 = vadd.f32 %v177_v29, %v176_v28 }
  0x21   :  { %124 = vst [vmem:[#allocation1] ss:$2 sm:$0xff] %v81_v17  ;;  %v122_v30 = vld.sshfl [vmem:[#allocation1 + $0x30] sm:$0xff pattern:$0x75316420]  ;;  %v162_v32 = vsel %vm160_vm0, %v116_v23, 0.0 }
  0x22   :  { %v123_v31 = vld.sshfl [vmem:[#allocation1 + $0x38] sm:$0xff pattern:$0x75316420]  ;;  %v167_v33 = vsel %vm160_vm0, %v117_v24, 0.0  ;;  %v192_v41 = vsel %vm160_vm0, %v122_v30, 0.0  ;;  %v163_v46 = vadd.f32 %v162_v32, %v161_v21 }
  0x23   :  { %127 = vst [vmem:[#allocation1 + $0x30] ss:$2 sm:$0xff] %v84_v22  ;;  %v120_v39 = vld.sshfl [vmem:[#allocation1 + $0x20] sm:$0xff pattern:$0x75316420]  ;;  %v197_v44 = vsel %vm160_vm0, %v123_v31, 0.0  ;;  %v168_v47 = vadd.f32 %v167_v33, %v166_v27  ;;  %v193_v57 = vadd.f32 %v192_v41, %v191_v34 }
  0x24   :  { %v121_v40 = vld.sshfl [vmem:[#allocation1 + $0x28] sm:$0xff pattern:$0x75316420]  ;;  %v182_v43 = vsel %vm160_vm0, %v120_v39, 0.0  ;;  %v198_v58 = vadd.f32 %v197_v44, %v196_v35  ;;  %v62_v22 = vld [vmem:[#allocation7] sm:$0x7] }
  0x25   :  { %126 = vst [vmem:[#allocation1 + $0x20] ss:$2 sm:$0xff] %v83_v25  ;;  %v187_v52 = vsel %vm160_vm0, %v121_v40, 0.0  ;;  %v183_v61 = vadd.f32 %v182_v43, %v181_v42  ;;  %v64_v23 = vsel %vm63_vm1, %v62_v22, 0.0 }
  0x26   :  { %v130_v45 = vld.sshfl [vmem:[#allocation1 + $0x10] sm:$0xff pattern:$0x75316420]  ;;  %v131_v48 = vld.sshfl [vmem:[#allocation1 + $0x18] sm:$0xff pattern:$0x75316420]  ;;  %v188_v3 = vadd.f32 %v187_v52, %v186_v51 }
  0x27   :  { %v174_v49 = vsel %vm160_vm0, %v130_v45, 0.0  ;;  %v179_v50 = vsel %vm160_vm0, %v131_v48, 0.0  ;;  %v65_v24 = vrot.slane %v64_v23, 4 }
  0x28   :  { %v175_v53 = vadd.f32 %v174_v49, %v173_v36  ;;  %v128_v54 = vld.sshfl [vmem:[#allocation1] sm:$0xff pattern:$0x75316420]  ;;  %v129_v55 = vld.sshfl [vmem:[#allocation1 + $0x8] sm:$0xff pattern:$0x75316420]  ;;  %v180_v56 = vadd.f32 %v179_v50, %v178_v37 }
  0x29   :  { %v164_v59 = vsel %vm160_vm0, %v128_v54, 0.0  ;;  %v169_v60 = vsel %vm160_vm0, %v129_v55, 0.0  ;;  %206 = vst [vmem:[#allocation1] ss:$4 sm:$0xff] %v202_v38  ;;  %v66_v25 = vadd.f32 %v65_v24, %v64_v23 }
  0x2a   :  { %280 = vmatpush.xpose.msra.mxu2 %v175_v53  ;;  %v165_v63 = vadd.f32 %v164_v59, %v163_v46  ;;  %v170_v0 = vadd.f32 %v169_v60, %v168_v47  ;;  %300 = vmatpush.xpose.msra.mxu3 %v180_v56  ;;  %v134_v1 = vld.sshfl [vmem:[#allocation1 + $0x30] sm:$0xff pattern:$0x75316420]  ;;  %v135_v2 = vld.sshfl [vmem:[#allocation1 + $0x38] sm:$0xff pattern:$0x75316420] }
  0x2b   :  { %v194_v4 = vsel %vm160_vm0, %v134_v1, 0.0  ;;  %v199_v5 = vsel %vm160_vm0, %v135_v2, 0.0  ;;  %v67_v26 = vrot.slane %v66_v25, 2 }
  0x2c   :  { %240 = vmatpush.xpose.msra.mxu0 %v165_v63  ;;  %260 = vmatpush.xpose.msra.mxu1 %v170_v0  ;;  %v195_v6 = vadd.f32 %v194_v4, %v193_v57  ;;  %v132_v7 = vld.sshfl [vmem:[#allocation1 + $0x20] sm:$0xff pattern:$0x75316420]  ;;  %v200_v8 = vadd.f32 %v199_v5, %v198_v58  ;;  %v133_v9 = vld.sshfl [vmem:[#allocation1 + $0x28] sm:$0xff pattern:$0x75316420] }
  0x2d   :  { %v184_v10 = vsel %vm160_vm0, %v132_v7, 0.0  ;;  %v189_v11 = vsel %vm160_vm0, %v133_v9, 0.0  ;;  %208 = vst [vmem:[#allocation1 + $0x20] ss:$4 sm:$0xff] %v203_v62  ;;  %v68_v27 = vadd.f32 %v67_v26, %v66_v25 }
  0x2e   :  { %360 = vmatpush.xpose.msrb.mxu2 %v195_v6  ;;  %v185_v12 = vadd.f32 %v184_v10, %v183_v61  ;;  %380 = vmatpush.xpose.msrb.mxu3 %v200_v8  ;;  %v190_v13 = vadd.f32 %v189_v11, %v188_v3 }
  0x2f   :  { %v69_v28 = vrot.slane %v68_v27, 1 }
  0x30   :  { %v211_v14 = vld.sshfl [vmem:[#allocation1 + $0x10] sm:$0xff pattern:$0x73625140]  ;;  %v209_v15 = vld.sshfl [vmem:[#allocation1] sm:$0xff pattern:$0x73625140]  ;;  %320 = vmatpush.xpose.msrb.mxu0 %v185_v12  ;;  %340 = vmatpush.xpose.msrb.mxu1 %v190_v13 }
  0x31   :  { %281 = vmatmul.f32.vlgmr.msra.gmra.mxu2 %v211_v14  ;;  %241 = vmatmul.f32.vlgmr.msra.gmra.mxu0 %v209_v15  ;;  %v210_v16 = vld.sshfl [vmem:[#allocation1 + $0x8] sm:$0xff pattern:$0x73625140]  ;;  %v212_v17 = vld.sshfl [vmem:[#allocation1 + $0x18] sm:$0xff pattern:$0x73625140]  ;;  %v70_v29 = vadd.f32 %v69_v28, %v68_v27 }
  0x32   :  { %261 = vmatmul.f32.vlgmr.msra.gmra.mxu1 %v210_v16  ;;  %301 = vmatmul.f32.vlgmr.msra.gmra.mxu3 %v212_v17 }
  0x33   :  { %72 = vst.msk [vmem:[#allocation8] sm:$0x3] %vm71_vm2, %v70_v29 }
  0x34   :  { %v215_v18 = vld.sshfl [vmem:[#allocation1 + $0x30] sm:$0xff pattern:$0x73625140]  ;;  %v213_v19 = vld.sshfl [vmem:[#allocation1 + $0x20] sm:$0xff pattern:$0x73625140] }
  0x35   :  { %v216_v20 = vld.sshfl [vmem:[#allocation1 + $0x38] sm:$0xff pattern:$0x73625140]  ;;  %v214_v21 = vld.sshfl [vmem:[#allocation1 + $0x28] sm:$0xff pattern:$0x73625140] }
  0x39   :  { %361 = vmatmul.f32.vlgmr.msrb.gmra.mxu2 %v215_v18  ;;  %321 = vmatmul.f32.vlgmr.msrb.gmra.mxu0 %v213_v19 }
  0x3a   :  { %381 = vmatmul.f32.vlgmr.msrb.gmra.mxu3 %v216_v20  ;;  %341 = vmatmul.f32.vlgmr.msrb.gmra.mxu1 %v214_v21  ;;  %v201_v44 = vld [vmem:[#allocation8] sm:$0x3] }
  0xae   :  { %v242_v30 = vpop.f32.mrf.mxu0 }
  0xaf   :  { %v262_v31 = vpop.f32.mrf.mxu1 }
  0xb0   :  { %v263_v32 = vadd.f32 %v262_v31, %v242_v30 }
  0xb4   :  { %v282_v33 = vpop.f32.mrf.mxu2 }
  0xb5   :  { %v283_v34 = vadd.f32 %v282_v33, %v263_v32  ;;  %v302_v35 = vpop.f32.mrf.mxu3 }
  0xb6   :  { %v322_v36 = vpop.f32.mrf.mxu0 }
  0xb7   :  { %v303_v37 = vadd.f32 %v302_v35, %v283_v34  ;;  %v342_v38 = vpop.f32.mrf.mxu1 }
  0xb9   :  { %v323_v39 = vadd.f32 %v322_v36, %v303_v37 }
  0xbb   :  { %v343_v40 = vadd.f32 %v342_v38, %v323_v39 }
  0xbc   :  { %v362_v41 = vpop.f32.mrf.mxu2 }
  0xbd   :  { %v363_v42 = vadd.f32 %v362_v41, %v343_v40  ;;  %v382_v43 = vpop.f32.mrf.mxu3 }
  0xbf   :  { %v383_v45 = vadd.f32 %v382_v43, %v363_v42 }
  0xc1   :  { %v385_v46 = vadd.f32 %v383_v45, %v201_v44 }
  0xc3   :  { %387 = vst.msk [vmem:[#allocation8] sm:$0x3] %vm71_vm2, %v385_v46 }
  0xca   :  { %v391_v47 = vld [vmem:[#allocation8] sm:$0x3] }
  0xcb   :  { %v392_v48 = vmul.f32 0.33333334, %v391_v47 }
  0xcd   :  { %393 = vst.msk [vmem:[#allocation8] sm:$0x3] %vm71_vm2, %v392_v48 }
  0xce   :  { %404 = dma.vmem_to_hbm [thread:$0]  %s400_s2, 32, %s402_s30, [#allocation4]  }
  0xcf   :  { %518 = dma.done.wait [#allocation4], 32  }
  0xd0   :  { %519 = vsyncadd [#allocation4], 4294967264 }
  0xd1   :  { %409 = vsyncpa [#allocation3], 1 }
  0xd2   :  { %410 = vsyncpa [#allocation6], 1 }
  0xd3   :  { %411 = vsyncpa [#allocation4], 1 }

</bundles_post_ra>
